<compile_context>
chip_gen: v5e
topology: v5e:2x2
jax: 0.10.0
libtpu: 0.0.40
codegen_flags: <defaults>
</compile_context>

<pallas_src>
import jax
import jax.numpy as jnp
from jax.experimental import pallas as pl
from jax.experimental.pallas import tpu as pltpu


def _conv_mm_kernel(w_ref, p_ref, b_ref, o_ref):
    # w_ref: (tc, Kp) weight block, p_ref: (Kp, tm) patch tile,
    # b_ref: (tc, 1)  bias block,   o_ref: (tc, tm) output tile (lane axis = M).
    acc = jnp.dot(w_ref[...], p_ref[...], preferred_element_type=jnp.float32)
    acc = jnp.maximum(acc + b_ref[...].astype(jnp.float32), 0.0)
    o_ref[...] = acc.astype(o_ref.dtype)


def _choose_tile_m(M, tm_max, kp, c_out, budget_bytes, in_bytes, out_bytes):
    """Largest M tile (multiple of 128) that fits the VMEM budget; prefer a
    tile that divides M exactly so no M-pad copy / ragged tile is needed."""
    fixed = 2 * (c_out * kp + c_out) * in_bytes              # weights + bias (dbl-buffered)
    per_col = 2 * kp * in_bytes + 2 * c_out * out_bytes      # patch + out bytes per M column
    fit = max(128, (budget_bytes - fixed) // per_col)
    cap = max(128, (min(int(tm_max), int(fit)) // 128) * 128)
    m128 = ((M + 127) // 128) * 128
    cap = min(cap, m128)
    if M % 128 == 0:
        units = M // 128
        for d in range(cap // 128, 0, -1):
            if units % d == 0:
                return d * 128
    return cap


def conv_layer_forward(x, weight, bias, *, tm_max=1024,
                       vmem_budget_bytes=24 << 20,
                       out_dtype=None, nchw_output=True):
    """Conv2d(stride=1, no padding) + ReLU.

    x:      (N, C_in, H, W)       float32
    weight: (C_out, C_in, kh, kw) float32  (PyTorch layout)
    bias:   (C_out,)              float32
    returns (N, C_out, Ho, Wo) if nchw_output else (C_out, N, Ho, Wo)
    """
    N, C, H, W = x.shape
    C_out, C_in, kh, kw = weight.shape
    assert C == C_in
    Ho, Wo = H - kh + 1, W - kw + 1
    M = N * Ho * Wo
    K = C * kh * kw
    Kp = ((K + 127) // 128) * 128
    out_dtype = x.dtype if out_dtype is None else out_dtype

    # --- im2col glue (wrapper-side JAX, (K, M) orientation) ----------------
    # pats[c*kh*kw + i*kw + j, n*Ho*Wo + ho*Wo + wo] = x[n, c, ho+i, wo+j]
    taps = [x[:, :, i:i + Ho, j:j + Wo] for i in range(kh) for j in range(kw)]
    w2d = weight.reshape(C_out, K)
    if C == 1:
        # Fold the K zero-pad into the stack: no separate full-matrix pad copy.
        if Kp != K:
            taps = taps + [jnp.zeros_like(taps[0])] * (Kp - K)
            w2d = jnp.pad(w2d, ((0, 0), (0, Kp - K)))
        pats = jnp.stack(taps, axis=2)                      # (N, 1, Kp, Ho, Wo)
        pats = jnp.transpose(pats, (1, 2, 0, 3, 4)).reshape(Kp, M)
    else:
        pats = jnp.stack(taps, axis=2)                      # (N, C, kh*kw, Ho, Wo)
        pats = jnp.transpose(pats, (1, 2, 0, 3, 4)).reshape(K, M)
        if Kp != K:
            pats = jnp.pad(pats, ((0, Kp - K), (0, 0)))
            w2d = jnp.pad(w2d, ((0, 0), (0, Kp - K)))
    b2d = bias.reshape(C_out, 1)

    in_bytes = jnp.dtype(x.dtype).itemsize
    ob = jnp.dtype(out_dtype).itemsize

    tm = _choose_tile_m(M, tm_max, Kp, C_out, vmem_budget_bytes, in_bytes, ob)
    n_m = -(-M // tm)                 # cdiv
    Mp = n_m * tm
    if Mp != M:
        # Rare path (M not a multiple of 128): pad ragged tail.
        pats = jnp.pad(pats, ((0, 0), (0, Mp - M)))

    # Split C_out across the grid only when the M grid alone cannot give >= 2
    # parallel steps (keeps patch HBM traffic 1x when M is large, but lets
    # both v7x TensorCores work even at tiny M).
    if n_m == 1 and C_out % 128 == 0 and C_out >= 256:
        tc = 128
    else:
        tc = C_out
    n_c = C_out // tc

    # Explicit VMEM accounting (double-buffered tiles) -> scoped limit.
    est_vmem = (2 * (tc * Kp + tc) * in_bytes     # weights + bias
                + 2 * Kp * tm * in_bytes          # patch tiles
                + 2 * tc * tm * ob)               # output tiles
    vmem_limit = int(min(max(2 * est_vmem, 16 << 20), 48 << 20))

    out2d = pl.pallas_call(
        _conv_mm_kernel,
        out_shape=jax.ShapeDtypeStruct((C_out, Mp), out_dtype),
        grid_spec=pltpu.PrefetchScalarGridSpec(
            num_scalar_prefetch=0,
            grid=(n_c, n_m),
            in_specs=[
                pl.BlockSpec((tc, Kp), lambda c, m: (c, 0)),   # weights: M-resident
                # TODO(synk): try pipeline_mode=pl.Buffered(3) here if xprof
                # shows the patch DMA exposed at large M.
                pl.BlockSpec((Kp, tm), lambda c, m: (0, m)),   # patch tile
                pl.BlockSpec((tc, 1), lambda c, m: (c, 0)),    # bias: M-resident
            ],
            out_specs=pl.BlockSpec((tc, tm), lambda c, m: (c, m)),
        ),
        compiler_params=pltpu.CompilerParams(
            dimension_semantics=("parallel", "parallel"),
            vmem_limit_bytes=vmem_limit,
        ),
    )(w2d, pats, b2d)

    if Mp != M:
        out2d = out2d[:, :M]                     # strip M padding (rare path)
    out = out2d.reshape(C_out, N, Ho, Wo)        # leading-dims reshape only
    if nchw_output:
        # Cheap at small Ho*Wo; large-shape consumers should take the native
        # (C_out, N, Ho, Wo) layout instead (nchw_output=False).
        out = jnp.transpose(out, (1, 0, 2, 3))
    return out


if __name__ == "__main__":
    key = jax.random.PRNGKey(0)
    kx, kwt, kb = jax.random.split(key, 3)

    # Module defaults: in_channels=1, out_channels=256, kernel_size=9, batchnorm=False.
    N, C_in, H, W = 2, 1, 16, 16
    C_out, ksz = 256, 9

    x = jax.random.normal(kx, (N, C_in, H, W), dtype=jnp.float32)
    weight = jax.random.normal(kwt, (C_out, C_in, ksz, ksz), dtype=jnp.float32) * 0.05
    bias = jax.random.normal(kb, (C_out,), dtype=jnp.float32) * 0.05

    out = conv_layer_forward(x, weight, bias)
    out = jax.block_until_ready(out)

    # Reference: pure-JAX conv + bias + ReLU.
    ref = jax.lax.conv_general_dilated(
        x, weight, window_strides=(1, 1), padding="VALID",
        dimension_numbers=("NCHW", "OIHW", "NCHW"),
    ) + bias.reshape(1, C_out, 1, 1)
    ref = jnp.maximum(ref, 0.0)

    assert out.shape == (N, C_out, H - ksz + 1, W - ksz + 1), out.shape
    assert jnp.allclose(out, ref, atol=1e-4, rtol=1e-4), float(jnp.max(jnp.abs(out - ref)))

    print("KERNEL_OK")
</pallas_src>

<mosaic_0001>
module attributes {stable_mosaic.version = 11 : i64} {
  func.func @_conv_mm_kernel(%arg0: i32, %arg1: i32, %arg2: memref<128x128xf32, #tpu.memory_space<vmem>>, %arg3: memref<128x128xf32, #tpu.memory_space<vmem>>, %arg4: memref<128x1xf32, #tpu.memory_space<vmem>>, %arg5: memref<128x128xf32, #tpu.memory_space<vmem>>) attributes {dimension_semantics = [#tpu.dimension_semantics<parallel>, #tpu.dimension_semantics<parallel>], iteration_bounds = array<i64: 2, 1>, scalar_prefetch = 0 : i64, scratch_operands = 0 : i64, tpu.core_type = #tpu.core_type<tc>, window_params = [{transform_indices = @transform_0, window_bounds = array<i64: 128, 128>}, {transform_indices = @transform_1, window_bounds = array<i64: 128, 128>}, {transform_indices = @transform_2, window_bounds = array<i64: 128, 1>}, {transform_indices = @transform_3, window_bounds = array<i64: 128, 128>}]} {
    %c0 = arith.constant 0 : index
    %c0_0 = arith.constant 0 : index
    %0 = vector.load %arg2[%c0, %c0_0] : memref<128x128xf32, #tpu.memory_space<vmem>>, vector<128x128xf32>
    %c0_1 = arith.constant 0 : index
    %c0_2 = arith.constant 0 : index
    %1 = vector.load %arg3[%c0_1, %c0_2] : memref<128x128xf32, #tpu.memory_space<vmem>>, vector<128x128xf32>
    %cst = arith.constant dense<0.000000e+00> : vector<128x128xf32>
    %2 = tpu.matmul %0, %1, %cst {dimension_numbers = #tpu.dot_dimension_numbers<[1], [0], [0], [1], [0, 0, 1, 1], [], []>} : vector<128x128xf32>, vector<128x128xf32>, vector<128x128xf32> -> vector<128x128xf32>
    %c0_3 = arith.constant 0 : index
    %c0_4 = arith.constant 0 : index
    %3 = vector.load %arg4[%c0_3, %c0_4] : memref<128x1xf32, #tpu.memory_space<vmem>>, vector<128x1xf32>
    %4 = vector.broadcast %3 : vector<128x1xf32> to vector<128x128xf32>
    %5 = arith.addf %2, %4 : vector<128x128xf32>
    %cst_5 = arith.constant 0.000000e+00 : f32
    %6 = vector.broadcast %cst_5 : f32 to vector<128x128xf32>
    %7 = arith.maximumf %5, %6 : vector<128x128xf32>
    %c0_6 = arith.constant 0 : index
    %c0_7 = arith.constant 0 : index
    %8 = vector.load %arg5[%c0_6, %c0_7] : memref<128x128xf32, #tpu.memory_space<vmem>>, vector<128x128xf32>
    tpu.vector_store %arg5[%c0_6, %c0_7], %7 {strides = array<i32>} : memref<128x128xf32, #tpu.memory_space<vmem>>, vector<128x128xf32>,
    return
  }
  func.func @transform_0(%arg0: i32, %arg1: i32) -> (i32, i32) {
    %c0_i32 = arith.constant 0 : i32
    %c0_i32_0 = arith.constant 0 : i32
    return %arg0, %c0_i32 : i32, i32
  }
  func.func @transform_1(%arg0: i32, %arg1: i32) -> (i32, i32) {
    %c0_i32 = arith.constant 0 : i32
    %c0_i32_0 = arith.constant 0 : i32
    return %c0_i32, %arg1 : i32, i32
  }
  func.func @transform_2(%arg0: i32, %arg1: i32) -> (i32, i32) {
    %c0_i32 = arith.constant 0 : i32
    %c0_i32_0 = arith.constant 0 : i32
    return %arg0, %c0_i32 : i32, i32
  }
  func.func @transform_3(%arg0: i32, %arg1: i32) -> (i32, i32) {
    %c0_i32 = arith.constant 0 : i32
    return %arg0, %arg1 : i32, i32
  }
}

</mosaic_0001>

<bundles_post_ra>
// kernel: tpu_custom_call.1
= control target key start
LH: loop header
LB: loop body
LE: loop exit
PB: predicated region body
PF: predicated region fallthrough
CT: control target
= control target key end

     0   :  { %8 = vsyncpa [#allocation3], 0  ;;  %s1020_s0 = inlined_call_operand.vmem [shape: f32[256,128], index: 0, kind: input, shape index: {}]   ;;  %s1021_s1 = inlined_call_operand.hbm [shape: f32[128,128], index: 1, kind: input, shape index: {}]   ;;  %s1022_s2 = inlined_call_operand.vmem [shape: f32[256,1], index: 2, kind: input, shape index: {}]   ;;  %s1023_s3 = inlined_call_operand.hbm [shape: f32[256,128], index: 3, kind: output, shape index: {}]  }
   0x1   :  { %9 = vsyncpa [#allocation4], 0 }
   0x2   :  { %11 = vsyncpa [#allocation4 + $0x1], 0  ;;  %s852_s12 = smov 0   ;;  %s854_s13 = smov 0  }
   0x3   :  { %s856_s14 = smov 0   ;;  %s858_s15 = smov 0  }
   0x4   :  { %s860_s16 = smov 0   ;;  %s862_s17 = smov 0  }
   0x5 LB: > { %s572_s18 = sadd.s32 4294967295, %s824_s17   ;;  %s573_s19 = sadd.s32 4294967294, %s824_s17   ;;  %s824_s17 = sphi %s862_s17, %s17_s17   ;;  %s820_s16 = sphi %s860_s16, %s1030_s16   ;;  %s816_s15 = sphi %s858_s15, %s1029_s15   ;;  %s812_s14 = sphi %s856_s14, %s1028_s14   ;;  %s808_s13 = sphi %s854_s13, %s1027_s13   ;;  %s804_s12 = sphi %s852_s12, %s1026_s12  }
   0x6   : > { %s29_s20 = sadd.s32 1, %s820_s16  ;;  %s116_s21 = sadd.s32 1, %s812_s14 }
   0x7   : > { %p31_p0 = scmp.ge.s32.totalorder %s29_s20, 2  ;;  %p126_p1 = scmp.ne.s32.totalorder %s812_s14, %s808_s13 }
   0x8   : > { %p127_p2 = scmp.eq.s32.totalorder %s572_s18, 1  ;;  %p132_p3 = scmp.ne.s32.totalorder %s808_s13, %s804_s12 }
   0x9   : > { %s1032_s20 = smov (%p31_p0, %s29_s20), 0  ;;  %p133_p5 = scmp.eq.s32.totalorder %s573_s19, 1 }
   0xa   : > { %p892_p4 = por %p127_p2, %p126_p1  ;;  %s111_s23 = ssub.s32 %s820_s16, %s1032_s20 }
   0xb   : > { %p574_p6 = scmp.ge.s32.totalorder %s824_s17, 1  ;;  %p114_p7 = scmp.eq.s32.totalorder %s111_s23, 0 }
   0xc   : > { %p899_p8 = por %p133_p5, %p132_p3  ;;  %p140_p9 = scmp.lt.s32.totalorder %s824_s17, 3 }
   0xd   : > { %s905_s25 = scalar_select %p114_p7, %s812_s14, %s116_s21  }
   0xe   : > { %p141_p10 = pnand %p574_p6, %p140_p9  ;;  %p652_p11 = scmp.eq.s32.totalorder %s572_s18, 0 }
   0xf   : > { %s153_s28 = sshll.u32 %s1021_s1, 4  ;;  %s826_s29 = smov [#allocation2]   ;;  %s154_s28 = int_to_ptr.hbm [resolvable:$true] %s153_s28 }
  0x10   : > { %p644_p12 = pneg %p141_p10  ;;  %s155_s30 = sshll.u32 %s826_s29, 4  ;;  %s156_s30 = int_to_ptr.vmem [resolvable:$true] %s155_s30 }
  0x11   : > { %s827_s4 = smov 128   ;;  %s828_s5 = smov 8  }
  0x12   : > { %p645_p13 = pnand %p652_p11, %p644_p12  ;;  %189 = sbr.rel (%p141_p10) target bundleno = 228 (0xe4), region = 32 }
  0x14   : > { %647 = dma.hbm_to_vmem [thread:$0]  (!%p645_p13), %s154_s28, 2048, %s156_s30, [#allocation3], %s827_s4, %s827_s4, %s828_s5  }
  0x17   : > { %795 = dma.done.wait (%p652_p11), [#allocation3], 2048  }
  0x18   : > { %797 = vsyncadd (%p652_p11), [#allocation3], 4294965248  ;;  %s580_s6 = sshll.u32 %s816_s15, 4  ;;  %v829_v0 = vmov 0   ;;  %v263_v2 = vld [vmem:[#allocation2 + $0x78] sm:$0xff]  ;;  %v262_v3 = vld [vmem:[#allocation2 + $0x70] sm:$0xff] }
  0x19   : > { %709 = vset.pattern.permute.xlu0 %v829_v0  ;;  %p220_p0 = scmp.lt.s32.totalorder %s580_s6, 31  ;;  %710 = vset.pattern.permute.xlu1 %v829_v0  ;;  %v261_v4 = vld [vmem:[#allocation2 + $0x68] sm:$0xff]  ;;  %v260_v5 = vld [vmem:[#allocation2 + $0x60] sm:$0xff]  ;;  %v259_v8 = vld [vmem:[#allocation2 + $0x58] sm:$0xff]  ;;  %s216_s21 = sand.u32 1, %s808_s13  }
  0x1a   : > { %711 = vset.pattern.permute.xlu2 %v829_v0  ;;  %360 = vmatpush.msra.mxu0 %v263_v2  ;;  %v258_v9 = vld [vmem:[#allocation2 + $0x50] sm:$0xff]  ;;  %v257_v10 = vld [vmem:[#allocation2 + $0x48] sm:$0xff]  ;;  %v256_v11 = vld [vmem:[#allocation2 + $0x40] sm:$0xff]  ;;  %s579_s23 = sshll.u32 %s216_s21, 7  ;;  %s589_s27 = sshll.u32 %s816_s15, 7 }
  0x1b   : > { %s1034_s6 = smov (!%p220_p0, %s580_s6), 31  ;;  %590 = vmatpush.msra.mxu1 %v263_v2  ;;  %591 = vmatpush.msra.mxu2 %v263_v2  ;;  %v255_v14 = vld [vmem:[#allocation2 + $0x38] sm:$0xff]  ;;  %v254_v15 = vld [vmem:[#allocation2 + $0x30] sm:$0xff]  ;;  %v253_v16 = vld [vmem:[#allocation2 + $0x28] sm:$0xff]  ;;  %s963_s26 = scalar_lea.vmem [#allocation5], %s579_s23 }
  0x1c   : > { %s581_s7 = sshll.u32 %s1034_s6, 3  ;;  %592 = vmatpush.msra.mxu3 %v263_v2  ;;  %361 = vmatpush.msra.mxu0 %v262_v3  ;;  %v252_v17 = vld [vmem:[#allocation2 + $0x20] sm:$0xff]  ;;  %v251_v20 = vld [vmem:[#allocation2 + $0x18] sm:$0xff]  ;;  %v250_v21 = vld [vmem:[#allocation2 + $0x10] sm:$0xff]  ;;  %s470_s30 = scalar_lea.hbm %s1023_s3, %s589_s27 }
  0x1d   : > { %s919_s10 = scalar_lea.vmem %s1022_s2, %s581_s7  ;;  %593 = vmatpush.msra.mxu1 %v262_v3  ;;  %594 = vmatpush.msra.mxu2 %v262_v3  ;;  %v249_v22 = vld [vmem:[#allocation2 + $0x8] sm:$0xff]  ;;  %s933_s19 = scalar_lea.vmem %s1020_s0, %s581_s7  ;;  %v248_v23 = vld [vmem:[#allocation2] sm:$0xff] }
  0x1e   : > { %v264_v1 = vld [vmem:[%s919_s10] sm:$0xff]  ;;  %595 = vmatpush.msra.mxu3 %v262_v3  ;;  %362 = vmatpush.msra.mxu0 %v261_v4  ;;  %v266_v6 = vld [vmem:[%s919_s10 + $0x10] sm:$0xff]  ;;  %v265_v7 = vld [vmem:[%s919_s10 + $0x8] sm:$0xff]  ;;  %s471_s4 = sshll.u32 %s963_s26, 4  ;;  %s473_s15 = sshll.u32 %s470_s30, 4  ;;  %s472_s4 = int_to_ptr.vmem [resolvable:$true] %s471_s4  ;;  %s474_s15 = int_to_ptr.hbm [resolvable:$true] %s473_s15 }
  0x1f   : > { %282 = vperm.xlu0 %709, %v264_v1   ;;  %596 = vmatpush.msra.mxu1 %v261_v4  ;;  %v267_v12 = vld [vmem:[%s919_s10 + $0x18] sm:$0xff]  ;;  %v270_v13 = vld [vmem:[%s919_s10 + $0x30] sm:$0xff]  ;;  %v273_v19 = vld [vmem:[%s919_s10 + $0x48] sm:$0xff]  ;;  %s458_s5 = scalar_lea.sflag [#allocation4], %s216_s21  ;;  %s756_s6 = sshra.s32 %s474_s15, 4  ;;  %s757_s6 = int_to_ptr.hbm [resolvable:$true] %s756_s6 }
  0x20   : > { %597 = vmatpush.msra.mxu2 %v261_v4  ;;  %598 = vmatpush.msra.mxu3 %v261_v4  ;;  %v271_v18 = vld [vmem:[%s919_s10 + $0x38] sm:$0xff]  ;;  %v232_v24 = vld [vmem:[%s933_s19] sm:$0xff]  ;;  %v274_v29 = vld [vmem:[%s919_s10 + $0x50] sm:$0xff]  ;;  %s758_s7 = scalar_lea.hbm %s757_s6, 128  ;;  %p763_p5 = scmp.lt.s32.totalorder %s757_s6, %s1023_s3 }
  0x21   : > { %363 = vmatpush.msra.mxu0 %v260_v5  ;;  %599 = vmatpush.msra.mxu1 %v260_v5  ;;  %v236_v25 = vld [vmem:[%s933_s19 + $0x20] sm:$0xff]  ;;  %v233_v31 = vld [vmem:[%s933_s19 + $0x8] sm:$0xff]  ;;  %v279_v37 = vld [vmem:[%s919_s10 + $0x78] sm:$0xff]  ;;  %p759_p1 = scmp.ne.s32.totalorder %s757_s6, %s758_s7 }
  0x22   : > { %600 = vmatpush.msra.mxu2 %v260_v5  ;;  %601 = vmatpush.msra.mxu3 %v260_v5  ;;  %v240_v26 = vld [vmem:[%s933_s19 + $0x40] sm:$0xff]  ;;  %v237_v32 = vld [vmem:[%s933_s19 + $0x28] sm:$0xff]  ;;  %v234_v38 = vld [vmem:[%s933_s19 + $0x10] sm:$0xff] }
  0x23   : > { %292 = vperm.xlu1 %710, %v266_v6   ;;  %364 = vmatpush.msra.mxu0 %v259_v8  ;;  %v244_v27 = vld [vmem:[%s933_s19 + $0x60] sm:$0xff]  ;;  %v241_v33 = vld [vmem:[%s933_s19 + $0x48] sm:$0xff]  ;;  %v238_v39 = vld [vmem:[%s933_s19 + $0x30] sm:$0xff]  ;;  %p760_p2 = pnand %p759_p1, %p892_p4 }
  0x24   : > { %602 = vmatpush.msra.mxu1 %v259_v8  ;;  %603 = vmatpush.msra.mxu2 %v259_v8  ;;  %v268_v28 = vld [vmem:[%s919_s10 + $0x20] sm:$0xff]  ;;  %v245_v34 = vld [vmem:[%s933_s19 + $0x68] sm:$0xff]  ;;  %v242_v40 = vld [vmem:[%s933_s19 + $0x50] sm:$0xff] }
  0x25   : > { %604 = vmatpush.msra.mxu3 %v259_v8  ;;  %365 = vmatpush.msra.mxu0 %v258_v9  ;;  %v276_v30 = vld [vmem:[%s919_s10 + $0x60] sm:$0xff]  ;;  %v269_v35 = vld [vmem:[%s919_s10 + $0x28] sm:$0xff]  ;;  %v246_v41 = vld [vmem:[%s933_s19 + $0x70] sm:$0xff]  ;;  %p761_p3 = pneg %p760_p2 }
  0x26   : > { %605 = vmatpush.msra.mxu1 %v258_v9  ;;  %606 = vmatpush.msra.mxu2 %v258_v9  ;;  %v277_v36 = vld [vmem:[%s919_s10 + $0x68] sm:$0xff]  ;;  %v272_v42 = vld [vmem:[%s919_s10 + $0x40] sm:$0xff]  ;;  %v235_v43 = vld [vmem:[%s933_s19 + $0x18] sm:$0xff] }
  0x27   : > { %287 = vperm.xlu0 %709, %v265_v7   ;;  %607 = vmatpush.msra.mxu3 %v258_v9  ;;  %v239_v44 = vld [vmem:[%s933_s19 + $0x38] sm:$0xff]  ;;  %v278_v48 = vld [vmem:[%s919_s10 + $0x70] sm:$0xff] }
  0x28   : > { %366 = vmatpush.msra.mxu0 %v257_v10  ;;  %608 = vmatpush.msra.mxu1 %v257_v10  ;;  %v243_v45 = vld [vmem:[%s933_s19 + $0x58] sm:$0xff] }
  0x29   : > { %609 = vmatpush.msra.mxu2 %v257_v10  ;;  %610 = vmatpush.msra.mxu3 %v257_v10  ;;  %v247_v46 = vld [vmem:[%s933_s19 + $0x78] sm:$0xff] }
  0x2a   : > { %367 = vmatpush.msra.mxu0 %v256_v11  ;;  %611 = vmatpush.msra.mxu1 %v256_v11  ;;  %v275_v47 = vld [vmem:[%s919_s10 + $0x58] sm:$0xff]  ;;  %s762_s10 = scalar_lea.hbm %s1023_s3, 256 }
  0x2b   : > { %612 = vmatpush.msra.mxu2 %v256_v11  ;;  %613 = vmatpush.msra.mxu3 %v256_v11  ;;  %p764_p6 = scmp.lt.s32.totalorder %s762_s10, %s758_s7 }
  0x2c   : > { %297 = vperm.xlu1 %710, %v267_v12   ;;  %368 = vmatpush.msra.mxu0 %v255_v14 }
  0x2d   : > { %614 = vmatpush.msra.mxu1 %v255_v14  ;;  %615 = vmatpush.msra.mxu2 %v255_v14  ;;  %p765_p7 = por %p764_p6, %p763_p5 }
  0x2e   : > { %616 = vmatpush.msra.mxu3 %v255_v14  ;;  %369 = vmatpush.msra.mxu0 %v254_v15 }
  0x2f   : > { %312 = vperm.xlu0 %709, %v270_v13   ;;  %617 = vmatpush.msra.mxu1 %v254_v15  ;;  %p766_p9 = pnand %p765_p7, %p761_p3 }
  0x30   : > { %618 = vmatpush.msra.mxu2 %v254_v15  ;;  %619 = vmatpush.msra.mxu3 %v254_v15 }
  0x31   : > { %370 = vmatpush.msra.mxu0 %v253_v16  ;;  %620 = vmatpush.msra.mxu1 %v253_v16 }
  0x32   : > { %621 = vmatpush.msra.mxu2 %v253_v16  ;;  %622 = vmatpush.msra.mxu3 %v253_v16 }
  0x33   : > { %371 = vmatpush.msra.mxu0 %v252_v17  ;;  %623 = vmatpush.msra.mxu1 %v252_v17 }
  0x34   : > { %624 = vmatpush.msra.mxu2 %v252_v17  ;;  %625 = vmatpush.msra.mxu3 %v252_v17 }
  0x35   : > { %317 = vperm.xlu1 %710, %v271_v18   ;;  %372 = vmatpush.msra.mxu0 %v251_v20 }
  0x36   : > { %626 = vmatpush.msra.mxu1 %v251_v20  ;;  %627 = vmatpush.msra.mxu2 %v251_v20 }
  0x37   : > { %327 = vperm.xlu0 %709, %v273_v19   ;;  %628 = vmatpush.msra.mxu3 %v251_v20 }
  0x38   : > { %373 = vmatpush.msra.mxu0 %v250_v21  ;;  %629 = vmatpush.msra.mxu1 %v250_v21 }
  0x39   : > { %630 = vmatpush.msra.mxu2 %v250_v21  ;;  %631 = vmatpush.msra.mxu3 %v250_v21 }
  0x3a   : > { %374 = vmatpush.msra.mxu0 %v249_v22  ;;  %632 = vmatpush.msra.mxu1 %v249_v22 }
  0x3b   : > { %633 = vmatpush.msra.mxu2 %v249_v22  ;;  %634 = vmatpush.msra.mxu3 %v249_v22 }
  0x3c   : > { %375 = vmatpush.msra.mxu0 %v248_v23  ;;  %635 = vmatpush.msra.mxu1 %v248_v23 }
  0x3d   : > { %636 = vmatpush.msra.mxu2 %v248_v23  ;;  %637 = vmatpush.msra.mxu3 %v248_v23 }
  0x3e   : > { %376 = vmatmul.f32.vlgmr.msra.gmra.mxu0 %v232_v24  ;;  %388 = vmatmul.f32.vlgmr.msra.gmra.mxu1 %v236_v25 }
  0x3f   : > { %400 = vmatmul.f32.vlgmr.msra.gmra.mxu2 %v240_v26  ;;  %412 = vmatmul.f32.vlgmr.msra.gmra.mxu3 %v244_v27 }
  0x40   : > { %302 = vperm.xlu2 %711, %v268_v28   ;;  %332 = vperm.xlu1 %710, %v274_v29  }
  0x41   : > { %342 = vperm.xlu0 %709, %v276_v30  }
  0x46   : > { %379 = vmatmul.f32.gmra.mxu0 %v233_v31  ;;  %391 = vmatmul.f32.gmra.mxu1 %v237_v32 }
  0x47   : > { %403 = vmatmul.f32.gmra.mxu2 %v241_v33  ;;  %415 = vmatmul.f32.gmra.mxu3 %v245_v34 }
  0x48   : > { %307 = vperm.xlu2 %711, %v269_v35   ;;  %347 = vperm.xlu1 %710, %v277_v36  }
  0x49   : > { %357 = vperm.xlu0 %709, %v279_v37  }
  0x4e   : > { %382 = vmatmul.f32.gmra.mxu0 %v234_v38  ;;  %394 = vmatmul.f32.gmra.mxu1 %v238_v39 }
  0x4f   : > { %406 = vmatmul.f32.gmra.mxu2 %v242_v40  ;;  %418 = vmatmul.f32.gmra.mxu3 %v246_v41 }
  0x50   : > { %322 = vperm.xlu2 %711, %v272_v42  }
  0x56   : > { %385 = vmatmul.f32.gmra.mxu0 %v235_v43  ;;  %397 = vmatmul.f32.gmra.mxu1 %v239_v44 }
  0x57   : > { %409 = vmatmul.f32.gmra.mxu2 %v243_v45  ;;  %421 = vmatmul.f32.gmra.mxu3 %v247_v46 }
  0x58   : > { %337 = vperm.xlu2 %711, %v275_v47  }
  0x60   : > { %352 = vperm.xlu2 %711, %v278_v48  }
  0x91   : > { %v283_v49 = vpop.permute.xlu0 %282 }
  0x95   : > { %v293_v50 = vpop.permute.xlu1 %292 }
  0x99   : > { %v288_v51 = vpop.permute.xlu0 %287 }
  0x9a   : > { %v303_v52 = vpop.permute.xlu2 %302 }
  0x9e   : > { %v298_v53 = vpop.permute.xlu1 %297 }
  0xa1   : > { %v313_v54 = vpop.permute.xlu0 %312 }
  0xa2   : > { %v308_v55 = vpop.permute.xlu2 %307 }
  0xa7   : > { %v318_v56 = vpop.permute.xlu1 %317 }
  0xa9   : > { %v328_v57 = vpop.permute.xlu0 %327 }
  0xaa   : > { %v323_v62 = vpop.permute.xlu2 %322 }
  0xb2   : > { %v333_v1 = vpop.permute.xlu1 %332  ;;  %v338_v15 = vpop.permute.xlu2 %337 }
  0xb3   : > { %v343_v3 = vpop.permute.xlu0 %342 }
  0xba   : > { %v348_v17 = vpop.permute.xlu1 %347  ;;  %v353_v30 = vpop.permute.xlu2 %352 }
  0xbb   : > { %v377_v58 = vpop.f32.mrf.mxu0  ;;  %v389_v59 = vpop.f32.mrf.mxu1 }
  0xbc   : > { %v378_v60 = vadd.f32 %v377_v58, %v283_v49  ;;  %v390_v61 = vadd.f32 %v389_v59, %v303_v52  ;;  %v358_v43 = vpop.permute.xlu0 %357 }
  0xbe   : > { %v425_v63 = vmax.f32 %v378_v60, 0.0  ;;  %v429_v0 = vmax.f32 %v390_v61, 0.0 }
  0xc0   : > { %441 = vst [vmem:[%s963_s26] sm:$0xff] %v425_v63 }
  0xc1   : > { %445 = vst [vmem:[%s963_s26 + $0x20] sm:$0xff] %v429_v0 }
  0xc2   : > { %v401_v2 = vpop.f32.mrf.mxu2  ;;  %v413_v5 = vpop.f32.mrf.mxu3 }
  0xc3   : > { %v402_v4 = vadd.f32 %v401_v2, %v323_v62  ;;  %v414_v6 = vadd.f32 %v413_v5, %v343_v3  ;;  %v380_v7 = vpop.f32.mrf.mxu0  ;;  %v392_v8 = vpop.f32.mrf.mxu1 }
  0xc4   : > { %v381_v10 = vadd.f32 %v380_v7, %v288_v51  ;;  %v393_v11 = vadd.f32 %v392_v8, %v308_v55 }
  0xc5   : > { %v433_v9 = vmax.f32 %v402_v4, 0.0  ;;  %v437_v12 = vmax.f32 %v414_v6, 0.0 }
  0xc6   : > { %v426_v13 = vmax.f32 %v381_v10, 0.0  ;;  %v430_v14 = vmax.f32 %v393_v11, 0.0 }
  0xc7   : > { %449 = vst [vmem:[%s963_s26 + $0x40] sm:$0xff] %v433_v9 }
  0xc8   : > { %453 = vst [vmem:[%s963_s26 + $0x60] sm:$0xff] %v437_v12 }
  0xc9   : > { %442 = vst [vmem:[%s963_s26 + $0x8] sm:$0xff] %v426_v13 }
  0xca   : > { %446 = vst [vmem:[%s963_s26 + $0x28] sm:$0xff] %v430_v14  ;;  %v404_v16 = vpop.f32.mrf.mxu2  ;;  %v416_v19 = vpop.f32.mrf.mxu3 }
  0xcb   : > { %v405_v18 = vadd.f32 %v404_v16, %v328_v57  ;;  %v417_v20 = vadd.f32 %v416_v19, %v348_v17  ;;  %v383_v21 = vpop.f32.mrf.mxu0  ;;  %v395_v22 = vpop.f32.mrf.mxu1 }
  0xcc   : > { %v384_v24 = vadd.f32 %v383_v21, %v293_v50  ;;  %v396_v25 = vadd.f32 %v395_v22, %v313_v54 }
  0xcd   : > { %v434_v23 = vmax.f32 %v405_v18, 0.0  ;;  %v438_v26 = vmax.f32 %v417_v20, 0.0 }
  0xce   : > { %v427_v27 = vmax.f32 %v384_v24, 0.0  ;;  %v431_v28 = vmax.f32 %v396_v25, 0.0 }
  0xcf   : > { %450 = vst [vmem:[%s963_s26 + $0x48] sm:$0xff] %v434_v23 }
  0xd0   : > { %454 = vst [vmem:[%s963_s26 + $0x68] sm:$0xff] %v438_v26 }
  0xd1   : > { %443 = vst [vmem:[%s963_s26 + $0x10] sm:$0xff] %v427_v27 }
  0xd2   : > { %447 = vst [vmem:[%s963_s26 + $0x30] sm:$0xff] %v431_v28  ;;  %v407_v29 = vpop.f32.mrf.mxu2  ;;  %v419_v32 = vpop.f32.mrf.mxu3 }
  0xd3   : > { %v408_v31 = vadd.f32 %v407_v29, %v333_v1  ;;  %v420_v33 = vadd.f32 %v419_v32, %v353_v30  ;;  %v386_v34 = vpop.f32.mrf.mxu0  ;;  %v398_v35 = vpop.f32.mrf.mxu1 }
  0xd4   : > { %v387_v37 = vadd.f32 %v386_v34, %v298_v53  ;;  %v399_v38 = vadd.f32 %v398_v35, %v318_v56 }
  0xd5   : > { %v435_v36 = vmax.f32 %v408_v31, 0.0  ;;  %v439_v39 = vmax.f32 %v420_v33, 0.0 }
  0xd6   : > { %v428_v40 = vmax.f32 %v387_v37, 0.0  ;;  %v432_v41 = vmax.f32 %v399_v38, 0.0 }
  0xd7   : > { %451 = vst [vmem:[%s963_s26 + $0x50] sm:$0xff] %v435_v36 }
  0xd8   : > { %455 = vst [vmem:[%s963_s26 + $0x70] sm:$0xff] %v439_v39 }
  0xd9   : > { %444 = vst [vmem:[%s963_s26 + $0x18] sm:$0xff] %v428_v40 }
  0xda   : > { %448 = vst [vmem:[%s963_s26 + $0x38] sm:$0xff] %v432_v41  ;;  %v410_v42 = vpop.f32.mrf.mxu2  ;;  %v422_v45 = vpop.f32.mrf.mxu3 }
  0xdb   : > { %v411_v44 = vadd.f32 %v410_v42, %v338_v15  ;;  %v423_v46 = vadd.f32 %v422_v45, %v358_v43 }
  0xdd   : > { %v436_v47 = vmax.f32 %v411_v44, 0.0  ;;  %v440_v48 = vmax.f32 %v423_v46, 0.0 }
  0xdf   : > { %452 = vst [vmem:[%s963_s26 + $0x58] sm:$0xff] %v436_v47 }
  0xe0   : > { %456 = vst [vmem:[%s963_s26 + $0x78] sm:$0xff] %v440_v48 }
  0xe1   : > { %769 = shalt.err (!%p766_p9)
}
  0xe2   : > { %s830_s19 = smov 128   ;;  %s831_s21 = smov 8  }
  0xe3   : > { %642 = dma.vmem_to_hbm [thread:$0]  (%p892_p4), %s472_s4, 2048, %s474_s15, %s458_s5, %s830_s19, %s830_s19, %s831_s21  }
  0xe4 PF: > { %p654_p10 = scmp.ge.s32.totalorder %s824_s17, 2  ;;  %s488_s23 = sand.u32 1, %s804_s12  }
  0xe5   : > { %s489_s26 = scalar_lea.sflag [#allocation4], %s488_s23 }
  0xe6   : > { %p649_p11 = pnand %p654_p10, %p899_p8 }
  0xe8   : > { %p650_p12 = pneg %p649_p11 }
  0xea   : > { %799 = dma.done.wait (%p650_p12), %s489_s26, 2048  }
  0xeb   : > { %801 = vsyncadd (%p650_p12), %s489_s26, 4294965248  ;;  %s17_s17 = sadd.s32 1, %s824_s17   ;;  %s1026_s12 = smov %s808_s13 }
  0xec   : > { %p14_p13 = scmp.ge.s32.totalorder %s17_s17, 4   ;;  %s1027_s13 = smov %s812_s14 }
  0xed   : > { %s1028_s14 = smov %s905_s25  ;;  %s1029_s15 = smov %s820_s16 }
  0xee   : > { %s1030_s16 = smov %s1032_s20  ;;  %16 = sbr.rel (!%p14_p13) target bundleno = 5 (0x5), region = 76 }
  0xf3   :  { %495 = vsyncpa [#allocation3], 1 }
  0xf4   :  { %497 = vsyncpa [#allocation3 + $0x1], 1 }
  0xf5   :  { %498 = vsyncpa [#allocation4], 1 }
  0xf6   :  { %500 = vsyncpa [#allocation4 + $0x1], 1 }

</bundles_post_ra>
